<compile_context>
chip_gen: v7x
topology: tpu7x:2x2x1
jax: 0.10.0
libtpu: 0.0.40
codegen_flags: <defaults>
</compile_context>

<pallas_src>
import functools

import jax
import jax.numpy as jnp
from jax.experimental import pallas as pl
from jax.experimental.pallas import tpu as pltpu

OUT_PAD = 128  # lane-dense output width (true output width is 2)


def _round_up(n, m):
    return ((n + m - 1) // m) * m


def _tail(h, e2, e3, w2_ref, w3_ref, w4_ref, b4_ref, o_ref):
    """Blocks 2/3 + output head. bf16 MXU inputs, f32 accumulate/elementwise."""
    h = jnp.dot(h.astype(jnp.bfloat16), w2_ref[...],
                preferred_element_type=jnp.float32)
    h = jnp.maximum(h + e2, 0.0)
    h = jnp.dot(h.astype(jnp.bfloat16), w3_ref[...],
                preferred_element_type=jnp.float32)
    h = jnp.maximum(h + e3, 0.0)
    y = jnp.dot(h.astype(jnp.bfloat16), w4_ref[...],
                preferred_element_type=jnp.float32)
    o_ref[...] = (y + b4_ref[...]).astype(o_ref.dtype)


def _mlp_kernel_onehot(x_ref, t_ref, tab_ref, w2_ref, w3_ref, w4_ref, b4_ref,
                       o_ref, *, n_steps, hidden):
    """Small-n_steps path: Linear-1 + embedding gather fused in one f32 matmul."""
    tile_b = x_ref.shape[0]
    x = x_ref[...]                                      # (tile_b, 2)  f32
    t = t_ref[...]                                      # (tile_b, 1)  i32

    steps = jax.lax.broadcasted_iota(jnp.int32, (tile_b, n_steps), 1)
    onehot = (t == steps).astype(jnp.float32)           # (tile_b, n_steps)
    xin = jnp.concatenate([x, onehot], axis=1)          # (tile_b, 2+n_steps)

    # [x | onehot] @ [[w1|0|0],[emb1+b1|emb2+b2|emb3+b3]] -> (x@w1+e1 | e2 | e3)
    # Kept f32: K is tiny and this preserves embedding values exactly.
    fused = jnp.dot(xin, tab_ref[...], preferred_element_type=jnp.float32)
    h = jnp.maximum(fused[:, 0:hidden], 0.0)
    e2 = fused[:, hidden:2 * hidden]
    e3 = fused[:, 2 * hidden:3 * hidden]
    _tail(h, e2, e3, w2_ref, w3_ref, w4_ref, b4_ref, o_ref)


def _mlp_kernel_gathered(x_ref, emb_ref, w1_ref, w2_ref, w3_ref, w4_ref,
                         b4_ref, o_ref, *, hidden):
    """Large-n_steps path: embeddings gathered in the wrapper, streamed per tile."""
    x = x_ref[...]                                      # (tile_b, 2)    f32
    emb = emb_ref[...]                                  # (tile_b, 3H)   f32 (biases folded in)
    e1 = emb[:, 0:hidden]
    e2 = emb[:, hidden:2 * hidden]
    e3 = emb[:, 2 * hidden:3 * hidden]

    # Linear(2 -> H) as two broadcast FMAs on the VPU (K=2 would waste the MXU).
    w1 = w1_ref[...]                                    # (2, H) f32
    h = x[:, 0:1] * w1[0:1, :] + x[:, 1:2] * w1[1:2, :] + e1
    h = jnp.maximum(h, 0.0)
    _tail(h, e2, e3, w2_ref, w3_ref, w4_ref, b4_ref, o_ref)


def mlp_diffusion_forward(x, t, params, *, block_b=2048, onehot_max_steps=128):
    """x: [B, 2] f32, t: [B] int, params: dict of f32 weights/biases/emb tables."""
    B = x.shape[0]
    H = params["w1"].shape[1]
    n_steps = params["emb1"].shape[0]

    # Fold biases into the embedding tables (they are summed in the forward
    # pass anyway); one concatenated table yields all three embeddings.
    emb_all = jnp.concatenate(
        [params["emb1"] + params["b1"][None, :],
         params["emb2"] + params["b2"][None, :],
         params["emb3"] + params["b3"][None, :]], axis=1)        # (n_steps, 3H)

    # bf16 weights for the MXU layers; output head zero-padded to 128 lanes.
    w2 = params["w2"].astype(jnp.bfloat16)
    w3 = params["w3"].astype(jnp.bfloat16)
    w4_pad = (jnp.zeros((H, OUT_PAD), jnp.float32)
              .at[:, :2].set(params["w4"]).astype(jnp.bfloat16))
    b4_pad = jnp.zeros((1, OUT_PAD), jnp.float32).at[0, :2].set(params["b4"])

    # --- batch tiling -------------------------------------------------------
    block_b = max(8, _round_up(block_b, 8))              # tile must be 8-aligned
    Bmin = _round_up(B, 8)
    tile_b = min(block_b, Bmin)
    # v7x has 2 TensorCores: keep >= 2 grid steps when the batch allows so the
    # "parallel" axis actually shards; on v5e/v6e this is harmless.
    if Bmin >= 16 and tile_b > Bmin // 2:
        tile_b = _round_up(Bmin // 2, 8)
    Bp = _round_up(B, tile_b)
    grid = (Bp // tile_b,)

    xp = jnp.pad(x, ((0, Bp - B), (0, 0)))
    # Padded rows reuse t=0 (valid index); their outputs are sliced off below.
    t2d = jnp.pad(t.astype(jnp.int32).reshape(B, 1), ((0, Bp - B), (0, 0)))

    batch = lambda shape: pl.BlockSpec(shape, lambda i: (i, 0))      # tiled
    resident = lambda shape: pl.BlockSpec(shape, lambda i: (0, 0))   # VMEM-resident
    # (Resident blocks are tiny (~150 KiB); double-buffering overhead ignored.)

    if n_steps <= onehot_max_steps:
        # Fused Linear-1 + gather table: [[w1 | 0 | 0], [emb_all]]  (2+n_steps, 3H)
        w1_row = jnp.concatenate(
            [params["w1"], jnp.zeros((2, 2 * H), jnp.float32)], axis=1)
        table = jnp.concatenate([w1_row, emb_all], axis=0)
        kernel = functools.partial(_mlp_kernel_onehot, n_steps=n_steps, hidden=H)
        in_specs = [
            batch((tile_b, 2)),                 # x tile
            batch((tile_b, 1)),                 # t tile
            resident((2 + n_steps, 3 * H)),     # fused w1 + emb+bias table (f32)
            resident((H, H)),                   # w2 (bf16)
            resident((H, H)),                   # w3 (bf16)
            resident((H, OUT_PAD)),             # w4 padded (bf16)
            resident((1, OUT_PAD)),             # b4 padded (f32)
        ]
        args = (xp, t2d, table, w2, w3, w4_pad, b4_pad)
    else:
        # Large n_steps: one-hot FLOPs would dominate -> gather with XLA and
        # stream the per-row embeddings as a tiled input block.
        emb_g = jnp.pad(emb_all[t], ((0, Bp - B), (0, 0)))           # (Bp, 3H)
        kernel = functools.partial(_mlp_kernel_gathered, hidden=H)
        in_specs = [
            batch((tile_b, 2)),                 # x tile
            batch((tile_b, 3 * H)),             # gathered emb+bias tile (f32)
            resident((2, H)),                   # w1 (f32)
            resident((H, H)),                   # w2 (bf16)
            resident((H, H)),                   # w3 (bf16)
            resident((H, OUT_PAD)),             # w4 padded (bf16)
            resident((1, OUT_PAD)),             # b4 padded (f32)
        ]
        args = (xp, emb_g, params["w1"], w2, w3, w4_pad, b4_pad)

    out = pl.pallas_call(
        kernel,
        out_shape=jax.ShapeDtypeStruct((Bp, OUT_PAD), jnp.float32),
        grid=grid,
        in_specs=in_specs,
        out_specs=batch((tile_b, OUT_PAD)),
        compiler_params=pltpu.CompilerParams(
            dimension_semantics=("parallel",)),   # shard batch over v7x's 2 TCs
    )(*args)
    return out[:B, :2]


def init_params(key, n_steps, num_units=128):
    ks = jax.random.split(key, 11)
    s = 0.02
    return {
        "w1": s * jax.random.normal(ks[0], (2, num_units), jnp.float32),
        "b1": s * jax.random.normal(ks[1], (num_units,), jnp.float32),
        "w2": s * jax.random.normal(ks[2], (num_units, num_units), jnp.float32),
        "b2": s * jax.random.normal(ks[3], (num_units,), jnp.float32),
        "w3": s * jax.random.normal(ks[4], (num_units, num_units), jnp.float32),
        "b3": s * jax.random.normal(ks[5], (num_units,), jnp.float32),
        "w4": s * jax.random.normal(ks[6], (num_units, 2), jnp.float32),
        "b4": s * jax.random.normal(ks[7], (2,), jnp.float32),
        "emb1": s * jax.random.normal(ks[8], (n_steps, num_units), jnp.float32),
        "emb2": s * jax.random.normal(ks[9], (n_steps, num_units), jnp.float32),
        "emb3": s * jax.random.normal(ks[10], (n_steps, num_units), jnp.float32),
    }


def reference_forward(x, t, p):
    """Pure-JAX f32 reference mirroring the PyTorch forward."""
    h = jnp.maximum(x @ p["w1"] + p["b1"] + p["emb1"][t], 0.0)
    h = jnp.maximum(h @ p["w2"] + p["b2"] + p["emb2"][t], 0.0)
    h = jnp.maximum(h @ p["w3"] + p["b3"] + p["emb3"][t], 0.0)
    return h @ p["w4"] + p["b4"]


def _check(out, ref):
    # bf16 MXU path intentionally deviates from f32 numerics -> looser tolerance.
    scale = float(jnp.max(jnp.abs(ref))) + 1e-6
    err = float(jnp.max(jnp.abs(out - ref)))
    assert err <= 2e-2 * scale + 1e-4, (err, scale)


if __name__ == "__main__":
    key = jax.random.PRNGKey(0)
    k_param, k_x, k_t = jax.random.split(key, 3)

    n_steps = 16
    num_units = 128
    batch = 20   # deliberately not a multiple of the tile -> exercises padding

    params = init_params(k_param, n_steps, num_units)
    x = jax.random.normal(k_x, (batch, 2), jnp.float32)
    t = jax.random.randint(k_t, (batch,), 0, n_steps, jnp.int32)

    # Small-n_steps path: fused one-hot gather, default (large) tiles -> grid of 2.
    out = jax.block_until_ready(mlp_diffusion_forward(x, t, params))
    ref = reference_forward(x, t, params)
    assert out.shape == (batch, 2), out.shape
    _check(out, ref)

    # Large-n_steps path: wrapper-gathered embeddings, small tiles -> multi-step grid.
    n_steps2 = 300
    params2 = init_params(jax.random.PRNGKey(1), n_steps2, num_units)
    t2 = jax.random.randint(jax.random.PRNGKey(2), (batch,), 0, n_steps2, jnp.int32)
    out2 = jax.block_until_ready(
        mlp_diffusion_forward(x, t2, params2, block_b=8))
    ref2 = reference_forward(x, t2, params2)
    assert out2.shape == (batch, 2), out2.shape
    _check(out2, ref2)

    print("KERNEL_OK")
</pallas_src>

<mosaic_0001>
module attributes {stable_mosaic.version = 11 : i64} {
  func.func @_mlp_kernel_onehot(%arg0: i32, %arg1: memref<16x2xf32, #tpu.memory_space<vmem>>, %arg2: memref<16x1xi32, #tpu.memory_space<vmem>>, %arg3: memref<18x384xf32, #tpu.memory_space<vmem>>, %arg4: memref<128x128xbf16, #tpu.memory_space<vmem>>, %arg5: memref<128x128xbf16, #tpu.memory_space<vmem>>, %arg6: memref<128x128xbf16, #tpu.memory_space<vmem>>, %arg7: memref<1x128xf32, #tpu.memory_space<vmem>>, %arg8: memref<16x128xf32, #tpu.memory_space<vmem>>) attributes {dimension_semantics = [#tpu.dimension_semantics<parallel>], iteration_bounds = array<i64: 2>, scalar_prefetch = 0 : i64, scratch_operands = 0 : i64, tpu.core_type = #tpu.core_type<tc>, window_params = [{transform_indices = @transform_0, window_bounds = array<i64: 16, 2>}, {transform_indices = @transform_1, window_bounds = array<i64: 16, 1>}, {pipeline_mode = #tpu.pipeline_mode<synchronous>, transform_indices = @transform_2, window_bounds = array<i64: 18, 384>}, {pipeline_mode = #tpu.pipeline_mode<synchronous>, transform_indices = @transform_3, window_bounds = array<i64: 128, 128>}, {pipeline_mode = #tpu.pipeline_mode<synchronous>, transform_indices = @transform_4, window_bounds = array<i64: 128, 128>}, {pipeline_mode = #tpu.pipeline_mode<synchronous>, transform_indices = @transform_5, window_bounds = array<i64: 128, 128>}, {pipeline_mode = #tpu.pipeline_mode<synchronous>, transform_indices = @transform_6, window_bounds = array<i64: 1, 128>}, {transform_indices = @transform_7, window_bounds = array<i64: 16, 128>}]} {
    %c0 = arith.constant 0 : index
    %c0_0 = arith.constant 0 : index
    %0 = vector.load %arg1[%c0, %c0_0] : memref<16x2xf32, #tpu.memory_space<vmem>>, vector<16x2xf32>
    %c0_1 = arith.constant 0 : index
    %c0_2 = arith.constant 0 : index
    %1 = vector.load %arg2[%c0_1, %c0_2] : memref<16x1xi32, #tpu.memory_space<vmem>>, vector<16x1xi32>
    %2 = tpu.iota {dimensions = array<i32: 1>} : vector<16x16xi32>
    %3 = vector.broadcast %1 : vector<16x1xi32> to vector<16x16xi32>
    %4 = arith.cmpi eq, %3, %2 : vector<16x16xi32>
    %5 = arith.extui %4 : vector<16x16xi1> to vector<16x16xi32>
    %6 = arith.sitofp %5 : vector<16x16xi32> to vector<16x16xf32>
    %7 = tpu.concatenate %0, %6 in 1 : vector<16x2xf32>, vector<16x16xf32> -> vector<16x18xf32>
    %c0_3 = arith.constant 0 : index
    %c0_4 = arith.constant 0 : index
    %8 = vector.load %arg3[%c0_3, %c0_4] : memref<18x384xf32, #tpu.memory_space<vmem>>, vector<18x384xf32>
    %cst = arith.constant dense<0.000000e+00> : vector<16x384xf32>
    %9 = tpu.matmul %7, %8, %cst {dimension_numbers = #tpu.dot_dimension_numbers<[1], [0], [0], [1], [0, 0, 1, 1], [], []>} : vector<16x18xf32>, vector<18x384xf32>, vector<16x384xf32> -> vector<16x384xf32>
    %10 = vector.extract_strided_slice %9 {offsets = [0, 0], sizes = [16, 128], strides = [1, 1]} : vector<16x384xf32> to vector<16x128xf32>
    %cst_5 = arith.constant 0.000000e+00 : f32
    %11 = vector.broadcast %cst_5 : f32 to vector<16x128xf32>
    %12 = arith.maximumf %10, %11 : vector<16x128xf32>
    %13 = vector.extract_strided_slice %9 {offsets = [0, 128], sizes = [16, 128], strides = [1, 1]} : vector<16x384xf32> to vector<16x128xf32>
    %14 = vector.extract_strided_slice %9 {offsets = [0, 256], sizes = [16, 128], strides = [1, 1]} : vector<16x384xf32> to vector<16x128xf32>
    %15 = arith.truncf %12 : vector<16x128xf32> to vector<16x128xbf16>
    %c0_6 = arith.constant 0 : index
    %c0_7 = arith.constant 0 : index
    %16 = vector.load %arg4[%c0_6, %c0_7] : memref<128x128xbf16, #tpu.memory_space<vmem>>, vector<128x128xbf16>
    %cst_8 = arith.constant dense<0.000000e+00> : vector<16x128xf32>
    %17 = tpu.matmul %15, %16, %cst_8 {dimension_numbers = #tpu.dot_dimension_numbers<[1], [0], [0], [1], [0, 0, 1, 1], [], []>} : vector<16x128xbf16>, vector<128x128xbf16>, vector<16x128xf32> -> vector<16x128xf32>
    %18 = arith.addf %17, %13 : vector<16x128xf32>
    %cst_9 = arith.constant 0.000000e+00 : f32
    %19 = vector.broadcast %cst_9 : f32 to vector<16x128xf32>
    %20 = arith.maximumf %18, %19 : vector<16x128xf32>
    %21 = arith.truncf %20 : vector<16x128xf32> to vector<16x128xbf16>
    %c0_10 = arith.constant 0 : index
    %c0_11 = arith.constant 0 : index
    %22 = vector.load %arg5[%c0_10, %c0_11] : memref<128x128xbf16, #tpu.memory_space<vmem>>, vector<128x128xbf16>
    %cst_12 = arith.constant dense<0.000000e+00> : vector<16x128xf32>
    %23 = tpu.matmul %21, %22, %cst_12 {dimension_numbers = #tpu.dot_dimension_numbers<[1], [0], [0], [1], [0, 0, 1, 1], [], []>} : vector<16x128xbf16>, vector<128x128xbf16>, vector<16x128xf32> -> vector<16x128xf32>
    %24 = arith.addf %23, %14 : vector<16x128xf32>
    %cst_13 = arith.constant 0.000000e+00 : f32
    %25 = vector.broadcast %cst_13 : f32 to vector<16x128xf32>
    %26 = arith.maximumf %24, %25 : vector<16x128xf32>
    %27 = arith.truncf %26 : vector<16x128xf32> to vector<16x128xbf16>
    %c0_14 = arith.constant 0 : index
    %c0_15 = arith.constant 0 : index
    %28 = vector.load %arg6[%c0_14, %c0_15] : memref<128x128xbf16, #tpu.memory_space<vmem>>, vector<128x128xbf16>
    %cst_16 = arith.constant dense<0.000000e+00> : vector<16x128xf32>
    %29 = tpu.matmul %27, %28, %cst_16 {dimension_numbers = #tpu.dot_dimension_numbers<[1], [0], [0], [1], [0, 0, 1, 1], [], []>} : vector<16x128xbf16>, vector<128x128xbf16>, vector<16x128xf32> -> vector<16x128xf32>
    %c0_17 = arith.constant 0 : index
    %c0_18 = arith.constant 0 : index
    %30 = vector.load %arg7[%c0_17, %c0_18] : memref<1x128xf32, #tpu.memory_space<vmem>>, vector<1x128xf32>
    %31 = vector.broadcast %30 : vector<1x128xf32> to vector<16x128xf32>
    %32 = arith.addf %29, %31 : vector<16x128xf32>
    %c0_19 = arith.constant 0 : index
    %c0_20 = arith.constant 0 : index
    %33 = vector.load %arg8[%c0_19, %c0_20] : memref<16x128xf32, #tpu.memory_space<vmem>>, vector<16x128xf32>
    tpu.vector_store %arg8[%c0_19, %c0_20], %32 {strides = array<i32>} : memref<16x128xf32, #tpu.memory_space<vmem>>, vector<16x128xf32>,
    return
  }
  func.func @transform_0(%arg0: i32) -> (i32, i32) {
    %c0_i32 = arith.constant 0 : i32
    %c0_i32_0 = arith.constant 0 : i32
    return %arg0, %c0_i32 : i32, i32
  }
  func.func @transform_1(%arg0: i32) -> (i32, i32) {
    %c0_i32 = arith.constant 0 : i32
    %c0_i32_0 = arith.constant 0 : i32
    return %arg0, %c0_i32 : i32, i32
  }
  func.func @transform_2(%arg0: i32) -> (i32, i32) {
    %c0_i32 = arith.constant 0 : i32
    %c0_i32_0 = arith.constant 0 : i32
    %c0_i32_1 = arith.constant 0 : i32
    return %c0_i32, %c0_i32_0 : i32, i32
  }
  func.func @transform_3(%arg0: i32) -> (i32, i32) {
    %c0_i32 = arith.constant 0 : i32
    %c0_i32_0 = arith.constant 0 : i32
    %c0_i32_1 = arith.constant 0 : i32
    return %c0_i32, %c0_i32_0 : i32, i32
  }
  func.func @transform_4(%arg0: i32) -> (i32, i32) {
    %c0_i32 = arith.constant 0 : i32
    %c0_i32_0 = arith.constant 0 : i32
    %c0_i32_1 = arith.constant 0 : i32
    return %c0_i32, %c0_i32_0 : i32, i32
  }
  func.func @transform_5(%arg0: i32) -> (i32, i32) {
    %c0_i32 = arith.constant 0 : i32
    %c0_i32_0 = arith.constant 0 : i32
    %c0_i32_1 = arith.constant 0 : i32
    return %c0_i32, %c0_i32_0 : i32, i32
  }
  func.func @transform_6(%arg0: i32) -> (i32, i32) {
    %c0_i32 = arith.constant 0 : i32
    %c0_i32_0 = arith.constant 0 : i32
    %c0_i32_1 = arith.constant 0 : i32
    return %c0_i32, %c0_i32_0 : i32, i32
  }
  func.func @transform_7(%arg0: i32) -> (i32, i32) {
    %c0_i32 = arith.constant 0 : i32
    %c0_i32_0 = arith.constant 0 : i32
    return %arg0, %c0_i32 : i32, i32
  }
}

</mosaic_0001>

<bundles_post_ra>
// kernel: tpu_custom_call.1
= control target key start
LH: loop header
LB: loop body
LE: loop exit
PB: predicated region body
PF: predicated region fallthrough
CT: control target
= control target key end

     0   :  { %12 = vsyncpa [#allocation3], 0  ;;  %s1770_s0 = inlined_call_operand.vmem [shape: f32[32,2], index: 0, kind: input, shape index: {}]   ;;  %s1771_s1 = inlined_call_operand.vmem [shape: s32[32,1], index: 1, kind: input, shape index: {}]   ;;  %s1772_s2 = inlined_call_operand.vmem [shape: f32[18,384], index: 2, kind: input, shape index: {}]   ;;  %s1773_s3 = inlined_call_operand.hbm [shape: bf16[128,128], index: 3, kind: input, shape index: {}]   ;;  %s1774_s4 = inlined_call_operand.hbm [shape: bf16[128,128], index: 4, kind: input, shape index: {}]   ;;  %s1775_s5 = inlined_call_operand.hbm [shape: bf16[128,128], index: 5, kind: input, shape index: {}]   ;;  %s1776_s6 = inlined_call_operand.vmem [shape: f32[1,128], index: 6, kind: input, shape index: {}]   ;;  %s1777_s7 = inlined_call_operand.hbm [shape: f32[32,128], index: 7, kind: output, shape index: {}]  }
   0x1   :  { %13 = vsyncpa [#allocation6], 0 }
   0x2   :  { %14 = vsyncpa [#allocation4], 0 }
   0x3   :  { %16 = vsyncpa [#allocation4 + $0x1], 0  ;;  %s1481_s24 = smov 0   ;;  %s1483_s25 = smov 0  }
   0x4   :  { %s1485_s26 = smov 0   ;;  %s1487_s27 = smov 0  }
   0x5 LB: > { %1784 = sst [smem:[#allocation12_spill]] %s1423_s26  ;;  %s1502_s28 = sadd.s32 4294967295, %s1427_s27   ;;  %s1427_s27 = sphi %s1487_s27, %s1799_s27   ;;  %s1423_s26 = sphi %s1485_s26, %s1801_s26   ;;  %s1419_s25 = sphi %s1483_s25, %s1803_s25   ;;  %s1415_s24 = sphi %s1481_s24, %s1802_s24  }
   0x6   : > { %s1006_s29 = sadd.s32 4294967294, %s1427_s27   ;;  %s1506_s30 = sadd.s32 1, %s1427_s27  }
   0x7   : > { %1785 = sst [smem:[#allocation13_spill]] %s1506_s30  ;;  %s186_s8 = sadd.s32 1, %s1423_s26 }
   0x8   : > { %s183_s9 = ssub.s32 %s1427_s27, %s1506_s30  ;;  %p196_p0 = scmp.ne.s32.totalorder %s1423_s26, %s1419_s25 }
   0x9   : > { %p184_p1 = scmp.eq.s32.totalorder %s183_s9, 0  ;;  %p197_p2 = scmp.eq.s32.totalorder %s1502_s28, 1 }
   0xa   : > { %p202_p3 = scmp.ne.s32.totalorder %s1419_s25, %s1415_s24  ;;  %p203_p4 = scmp.eq.s32.totalorder %s1006_s29, 1 }
   0xb   : > { %s1517_s10 = scalar_select %p184_p1, %s1423_s26, %s186_s8  }
   0xc   : > { %p1519_p5 = por %p197_p2, %p196_p0  ;;  %p1523_p6 = por %p203_p4, %p202_p3 }
   0xd   : > { %1786 = sst [smem:[#allocation14_spill]] %s1517_s10  ;;  %p1007_p7 = scmp.ge.s32.totalorder %s1427_s27, 1 }
   0xe   : > { %s1787_s11 = scalar_select %p1519_p5, 1, 0 }
   0xf   : > { %s1788_s12 = scalar_select %p1523_p6, 1, 0 }
  0x10   : > { %p210_p8 = scmp.lt.s32.totalorder %s1427_s27, 3  ;;  %p1778_p9 = scmp.eq.s32.totalorder %s1502_s28, 0 }
  0x11   : > { %s1429_s14 = smov [#allocation5]   ;;  %s1430_s17 = smov [#allocation2]  }
  0x12   : > { %p1530_p10 = pnand %p1007_p7, %p210_p8  ;;  %s238_s15 = sshll.u32 %s1429_s14, 4  ;;  %s1536_s15 = int_to_ptr.vmem [resolvable:$true] %s238_s15 }
  0x13   : > { %s225_s18 = sshll.u32 %s1430_s17, 4  ;;  %s1431_s19 = smov [#allocation7]   ;;  %s1544_s18 = int_to_ptr.vmem [resolvable:$true] %s225_s18 }
  0x14   : > { %s1789_s13 = scalar_select %p1530_p10, 1, 0 }
  0x15   : > { %p1184_p11 = pneg %p1530_p10  ;;  %s1546_s20 = sshll.u32 %s1431_s19, 4  ;;  %s252_s20 = int_to_ptr.vmem [resolvable:$true] %s1546_s20 }
  0x16   : > { %s1273_s23 = scalar_lea.hbm %s1774_s4, 1024 }
  0x17   : > { %p1540_p12 = pnand %p1778_p9, %p1184_p11  ;;  %p1274_p13 = scmp.ne.s32.totalorder %s1774_s4, %s1273_s23 }
  0x18   : > { %p1280_p3 = scmp.lt.u32.totalorder %s1273_s23, %s1774_s4 }
  0x19   : > { %p1556_p0 = pneg %p1540_p12 }
  0x1b   : > { %p1276_p1 = pnand %p1556_p0, %p1274_p13 }
  0x1d   : > { %p1277_p2 = pneg %p1276_p1 }
  0x1f   : > { %p1282_p4 = pnand %p1280_p3, %p1277_p2 }
  0x21   : > { %1285 = shalt.err (!%p1282_p4)
}
  0x22   : > { %s1286_s19 = scalar_lea.vmem %s1536_s15, 1024  ;;  %p1294_p9 = scmp.lt.s32.totalorder %s1536_s15, %s1536_s15 }
  0x23   : > { %p1287_p7 = scmp.ne.s32.totalorder %s1536_s15, %s1286_s19  ;;  %p1295_p6 = scmp.lt.s32.totalorder %s1286_s19, %s1286_s19 }
  0x25   : > { %p1289_p8 = pnand %p1287_p7, %p1556_p0  ;;  %p1296_p13 = por %p1295_p6, %p1294_p9 }
  0x27   : > { %p1290_p11 = pneg %p1289_p8 }
  0x29   : > { %p1297_p1 = pnand %p1296_p13, %p1290_p11 }
  0x2b   : > { %1300 = shalt.err (!%p1297_p1)
}
  0x2c   : > { %s1432_s21 = smov 64   ;;  %s1433_s22 = smov 4  }
  0x2d   : > { %1190 = dma.hbm_to_vmem [thread:$0]  (!%p1540_p12), %s1774_s4, 1024, %s1536_s15, [#allocation6], %s1432_s21, %s1432_s21, %s1433_s22  }
  0x2e   : > { %s1301_s17 = scalar_lea.hbm %s1773_s3, 1024 }
  0x2f   : > { %p1302_p6 = scmp.ne.s32.totalorder %s1773_s3, %s1301_s17  ;;  %p1308_p3 = scmp.lt.u32.totalorder %s1301_s17, %s1773_s3 }
  0x31   : > { %p1304_p9 = pnand %p1302_p6, %p1556_p0 }
  0x33   : > { %p1305_p2 = pneg %p1304_p9 }
  0x35   : > { %p1310_p4 = pnand %p1308_p3, %p1305_p2 }
  0x37   : > { %1313 = shalt.err (!%p1310_p4)
}
  0x38   : > { %s1314_s15 = scalar_lea.vmem %s1544_s18, 1024  ;;  %p1322_p13 = scmp.lt.s32.totalorder %s1544_s18, %s1544_s18 }
  0x39   : > { %p1315_p7 = scmp.ne.s32.totalorder %s1544_s18, %s1314_s15  ;;  %p1323_p1 = scmp.lt.s32.totalorder %s1314_s15, %s1314_s15 }
  0x3b   : > { %p1317_p8 = pnand %p1315_p7, %p1556_p0  ;;  %p1324_p6 = por %p1323_p1, %p1322_p13 }
  0x3d   : > { %p1318_p11 = pneg %p1317_p8 }
  0x3f   : > { %p1325_p9 = pnand %p1324_p6, %p1318_p11 }
  0x41   : > { %1328 = shalt.err (!%p1325_p9)
}
  0x42   : > { %1187 = dma.hbm_to_vmem [thread:$0]  (!%p1540_p12), %s1773_s3, 1024, %s1544_s18, [#allocation3], %s1432_s21, %s1432_s21, %s1433_s22  }
  0x43   : > { %s1329_s29 = scalar_lea.hbm %s1775_s5, 1024 }
  0x44   : > { %p1330_p2 = scmp.ne.s32.totalorder %s1775_s5, %s1329_s29  ;;  %p1336_p7 = scmp.lt.u32.totalorder %s1329_s29, %s1775_s5 }
  0x46   : > { %p1332_p3 = pnand %p1330_p2, %p1556_p0 }
  0x48   : > { %p1333_p4 = pneg %p1332_p3 }
  0x4a   : > { %p1338_p8 = pnand %p1336_p7, %p1333_p4 }
  0x4c   : > { %1341 = shalt.err (!%p1338_p8)
}
  0x4d   : > { %s1342_s15 = scalar_lea.vmem %s252_s20, 1024  ;;  %p1350_p6 = scmp.lt.s32.totalorder %s252_s20, %s252_s20 }
  0x4e   : > { %p1343_p11 = scmp.ne.s32.totalorder %s252_s20, %s1342_s15  ;;  %p1351_p9 = scmp.lt.s32.totalorder %s1342_s15, %s1342_s15 }
  0x50   : > { %p1345_p13 = pnand %p1343_p11, %p1556_p0  ;;  %p1352_p5 = por %p1351_p9, %p1350_p6 }
  0x52   : > { %p1346_p1 = pneg %p1345_p13 }
  0x54   : > { %p1353_p10 = pnand %p1352_p5, %p1346_p1 }
  0x56   : > { %1356 = shalt.err (!%p1353_p10)
}
  0x57   : > { %1193 = dma.hbm_to_vmem [thread:$0]  (!%p1540_p12), %s1775_s5, 1024, %s252_s20, [#allocation6], %s1432_s21, %s1432_s21, %s1433_s22  }
  0x58   : > { %p1792_p2 = scmp.ne.s32.totalorder %s1789_s13, 0 }
  0x59   : > { %p1793_p0 = scmp.eq.s32.totalorder (!%p1792_p2), %s1502_s28, 0 }
  0x5a   : > { %288 = sbr.rel (%p1792_p2) target bundleno = 1245 (0x4dd), region = 48 }
  0x61   : > { %1402 = dma.done.wait (%p1793_p0), [#allocation3], 1024   ;;  %p1794_p3 = pmov %p1793_p0 }
  0x62   : > { %p1795_p5 = pmov %p1793_p0 }
  0x63   : > { %1404 = vsyncadd (%p1794_p3), [#allocation3], 4294966272 }
  0x64   : > { %1406 = dma.done.wait (%p1795_p5), [#allocation6], 2048   ;;  %p1796_p10 = pmov %p1793_p0 }
  0x65   : > { %s1017_s16 = sshll.u32 %s1502_s28, 1  ;;  %v1434_v0 = vmov 0   ;;  %v1435_v3 = vmov 0.0   ;;  %v377_v4 = vld [vmem:[%s1772_s2 + $0x8] sm:$0xff]  ;;  %v380_v5 = vld [vmem:[%s1772_s2 + $0x20] sm:$0xff]  ;;  %v379_v8 = vld [vmem:[%s1772_s2 + $0x18] sm:$0xff]  ;;  %v351_v15 = vlaneseq }
  0x66   : > { %1408 = vsyncadd (%p1796_p10), [#allocation6], 4294965248  ;;  %1248 = vset.pattern.permute.xlu0 %v1434_v0  ;;  %p334_p12 = scmp.lt.s32.totalorder %s1017_s16, 3  ;;  %466 = vmatprep.mubr.f32.mxu1 %v1435_v3  ;;  %v376_v6 = vld [vmem:[%s1772_s2] sm:$0xff]  ;;  %v1162_v7 = vpack.c.bf16 %v380_v5, %v377_v4  ;;  %v383_v9 = vld [vmem:[%s1772_s2 + $0x38] sm:$0x3] }
  0x67   : > { %1102 = vmatprep.subr.bf16.mxu0 %v1435_v3  ;;  %vm392_vm0 = vcmask 1041408   ;;  %v1164_v10 = vpack.c.bf16 %v379_v8, %v376_v6  ;;  %v382_v11 = vld [vmem:[%s1772_s2 + $0x30] sm:$0x3]  ;;  %v381_v13 = vld [vmem:[%s1772_s2 + $0x28] sm:$0xff]  ;;  %v352_v16 = vand.u32 127, %v351_v15  ;;  %s1436_s30 = smov 2  }
  0x68   : > { %s1805_s16 = smov (!%p334_p12, %s1017_s16), 3  ;;  %1163 = vmatprep.subr.bf16.mxu1 %v1162_v7  ;;  %v378_v12 = vld [vmem:[%s1772_s2 + $0x10] sm:$0xff]  ;;  %v1249_v17 = vld [vmem:[#allocation2] sm:$0xff]   ;;  %v1251_v22 = vld [vmem:[#allocation2 + $0x10] sm:$0xff]   ;;  %vm373_vm3 = vcmask 15360   ;;  %vm385_vm4 = vcmask 146432  }
  0x69   : > { %s1018_s13 = sshll.u32 %s1805_s16, 3  ;;  %1165 = vmatpush1.bf16.msra.mxu1 %v1164_v10  ;;  %v1166_v14 = vpack.c.bf16 %v381_v13, %v378_v12  ;;  %1103 = vmatpush3.bf16.msra.mxu0 %v1249_v17  ;;  %v1250_v19 = vld [vmem:[#allocation2 + $0x8] sm:$0xff]   ;;  %v1252_v24 = vld [vmem:[#allocation2 + $0x18] sm:$0xff]   ;;  %v1253_v25 = vld [vmem:[#allocation2 + $0x20] sm:$0xff]   ;;  %vm1437_vm5 = vmmov 0   ;;  %s330_s16 = sand.u32 1, %s1419_s25  }
  0x6a   : > { %s343_s21 = scalar_lea.vmem %s1771_s1, %s1018_s13  ;;  %1023 = vmatprep.subr.msk.mxu1 %vm392_vm0, %v383_v9  ;;  %1104 = vmatprep.subr.bf16.mxu0 %v1435_v3  ;;  %v1254_v26 = vld [vmem:[#allocation2 + $0x28] sm:$0xff]   ;;  %s337_s29 = scalar_lea.vmem %s1770_s0, %s1018_s13  ;;  %v384_v30 = vld [vmem:[%s1772_s2 + $0x40] sm:$0x3]  ;;  %v1255_v34 = vld [vmem:[#allocation2 + $0x30] sm:$0xff]  }
  0x6b   : > { %v349_v1 = vld [vmem:[%s343_s21] sm:$0xff]  ;;  %v350_v2 = vld [vmem:[%s343_s21 + $0x8] sm:$0xff]  ;;  %1118 = vmatprep.mubr.msk.bf16.mxu0 %vm1437_vm5, %v1435_v3  ;;  %v1258_v37 = vld [vmem:[#allocation5 + $0x8] sm:$0xff]   ;;  %s1016_s13 = sshll.u32 %s330_s16, 4  ;;  %s1060_s26 = sshll.u32 %s1502_s28, 8 }
  0x6c   : > { %354 = vperm.xlu0 %1248, %v349_v1   ;;  %v347_v27 = vld [vmem:[%s337_s29] sm:$0xff]  ;;  %v348_v31 = vld [vmem:[%s337_s29 + $0x8] sm:$0xff]  ;;  %v1259_v38 = vld [vmem:[#allocation5 + $0x10] sm:$0xff]   ;;  %s332_s15 = scalar_lea.vmem [#allocation8], %s1016_s13  ;;  %s1727_s21 = scalar_lea.hbm %s1777_s7, %s1060_s26 }
  0x6d   : > { %1024 = vmatpush1.msk.msra.mxu1 %vm392_vm0, %v382_v11  ;;  %1105 = vmatpush3.bf16.msra.mxu0 %v1250_v19  ;;  %v1256_v35 = vld [vmem:[#allocation2 + $0x38] sm:$0xff]   ;;  %v1257_v36 = vld [vmem:[#allocation5] sm:$0xff]   ;;  %v1262_v41 = vld [vmem:[#allocation5 + $0x28] sm:$0xff]   ;;  %s901_s18 = sshll.u32 %s332_s15, 4  ;;  %s1729_s22 = scalar_lea.sflag [#allocation4], %s330_s16  ;;  %s1722_s18 = int_to_ptr.vmem [resolvable:$true] %s901_s18 }
  0x6e   : > { %1167 = vmatprep.subr.bf16.mxu1 %v1166_v14  ;;  %1106 = vmatprep.subr.bf16.mxu0 %v1435_v3  ;;  %v1260_v39 = vld [vmem:[#allocation5 + $0x18] sm:$0xff]   ;;  %v1261_v40 = vld [vmem:[#allocation5 + $0x20] sm:$0xff]   ;;  %v1263_v51 = vld [vmem:[#allocation5 + $0x30] sm:$0xff]   ;;  %s1357_s28 = scalar_lea.vmem %s1722_s18, 256  ;;  %p1797_p7 = scmp.ne.s32.totalorder %s1787_s11, 0 }
  0x6f   : > { %v1264_v52 = vld [vmem:[#allocation5 + $0x38] sm:$0xff]   ;;  %v1265_v53 = vld [vmem:[#allocation7] sm:$0xff]   ;;  %v1266_v54 = vld [vmem:[#allocation7 + $0x8] sm:$0xff]   ;;  %p1358_p4 = scmp.ne.s32.totalorder %s1722_s18, %s1357_s28 }
  0x70   : > { %357 = vperm.xlu0 %1248, %v350_v2   ;;  %v1267_v55 = vld [vmem:[#allocation7 + $0x10] sm:$0xff]   ;;  %v1268_v56 = vld [vmem:[#allocation7 + $0x18] sm:$0xff]   ;;  %v1269_v57 = vld [vmem:[#allocation7 + $0x20] sm:$0xff]  }
  0x71   : > { %1107 = vmatpush3.bf16.msra.mxu0 %v1251_v22  ;;  %v1270_v58 = vld [vmem:[#allocation7 + $0x28] sm:$0xff]   ;;  %v1271_v5 = vld [vmem:[#allocation7 + $0x30] sm:$0xff]   ;;  %v1272_v6 = vld [vmem:[#allocation7 + $0x38] sm:$0xff]   ;;  %p1359_p8 = pnand %p1358_p4, %p1797_p7 }
  0x72   : > { %1108 = vmatprep.subr.bf16.mxu0 %v1435_v3 }
  0x73   : > { %p1360_p11 = pneg %p1359_p8 }
  0x75   : > { %1109 = vmatpush3.bf16.msra.mxu0 %v1252_v24 }
  0x76   : > { %1110 = vmatprep.subr.bf16.mxu0 %v1435_v3 }
  0x79   : > { %1111 = vmatpush3.bf16.msra.mxu0 %v1253_v25 }
  0x7a   : > { %1112 = vmatprep.subr.bf16.mxu0 %v1435_v3 }
  0x7d   : > { %1113 = vmatpush3.bf16.msra.mxu0 %v1254_v26 }
  0x7e   : > { %1114 = vmatprep.subr.bf16.mxu0 %v1435_v3 }
  0x81   : > { %1115 = vmatpush3.bf16.msra.mxu0 %v1255_v34 }
  0x82   : > { %1116 = vmatprep.subr.bf16.mxu0 %v1435_v3 }
  0x85   : > { %1117 = vmatpush3.bf16.msra.mxu0 %v1256_v35 }
  0x86   : > { %1142 = vmatprep.subr.bf16.mxu0 %v1435_v3 }
  0xeb   : > { %v355_v18 = vpop.permute.xlu0 %354 }
  0xec   : > { %vm359_vm1 = vcmp.eq.s32.totalorder %v355_v18, %v352_v16 }
  0xed   : > { %v1021_v20 = vsel %vm359_vm1, 1.0, %v1435_v3 }
  0xee   : > { %367 = vrot.lane.b32.xlu1 %v1021_v20, %s1436_s30 }
  0xef   : > { %v358_v21 = vpop.permute.xlu0 %357 }
  0xf0   : > { %vm360_vm2 = vcmp.eq.s32.totalorder %v358_v21, %v352_v16  ;;  %v1046_v16 = vld [vmem:[%s1776_s6] ss:$0 sm:$0xff] }
  0xf1   : > { %v1022_v23 = vsel %vm360_vm2, 1.0, %v1435_v3 }
  0xf2   : > { %369 = vrot.lane.b32.xlu1 %v1022_v23, %s1436_s30  ;;  %s1438_s30 = smov [#allocation8]  }
  0xf3   : > { %s1361_s10 = sshll.u32 %s1438_s30, 4  ;;  %s1362_s10 = int_to_ptr.vmem [resolvable:$false] %s1361_s10 }
  0xf4   : > { %s1363_s23 = scalar_lea.vmem %s1362_s10, 512  ;;  %p1364_p13 = scmp.lt.s32.totalorder %s1722_s18, %s1362_s10 }
  0xf5   : > { %p1365_p1 = scmp.lt.s32.totalorder %s1363_s23, %s1357_s28 }
  0xf7   : > { %p1366_p6 = por %p1365_p1, %p1364_p13 }
  0xf9   : > { %p1367_p9 = pnand %p1366_p6, %p1360_p11 }
 0x160   : > { %v368_v28 = vpop.permute.xlu1 %367 }
 0x161   : > { %v374_v29 = vsel %vm373_vm3, %v347_v27, %v368_v28 }
 0x162   : > { %1025 = vmatmul.mubr.msk.f32.vlgmr.msra.gmra.mrb[0].mxu1 %vm385_vm4, %v374_v29 }
 0x163   : > { %472 = vmatprep.mubr.f32.mxu1 %v1435_v3  ;;  %1169 = vmatpush3.bf16.msra.mxu1 %v1166_v14 }
 0x164   : > { %v370_v32 = vpop.permute.xlu1 %369  ;;  %1097 = vmatprep.subr.msk.mxu1 %vm392_vm0, %v384_v30 }
 0x165   : > { %v375_v33 = vsel %vm373_vm3, %v348_v31, %v370_v32 }
 0x166   : > { %1026 = vmatmul.mubr.msk.f32.gmra.mrb[2].mxu1 %vm385_vm4, %v375_v33 }
 0x167   : > { %1099 = vmatprep.mubr.msk.f32.mxu1 %vm385_vm4, %v374_v29  ;;  %1098 = vmatpush3.msk.msra.mxu1 %vm392_vm0, %v384_v30 }
 0x168   : > { %1122 = vmatprep.subr.bf16.mxu1 %v1435_v3 }
 0x16a   : > { %1100 = vmatmul.mubr.msk.f32.vlgmr.msra.gmra.mrb[4].mxu1 %vm385_vm4, %v375_v33 }
 0x16b   : > { %1138 = vmatprep.mubr.msk.bf16.mxu1 %vm1437_vm5, %v1435_v3  ;;  %1123 = vmatpush3.bf16.msra.mxu1 %v1257_v36 }
 0x16c   : > { %1124 = vmatprep.subr.bf16.mxu1 %v1435_v3 }
 0x16f   : > { %1125 = vmatpush3.bf16.msra.mxu1 %v1258_v37 }
 0x170   : > { %1126 = vmatprep.subr.bf16.mxu1 %v1435_v3 }
 0x173   : > { %1127 = vmatpush3.bf16.msra.mxu1 %v1259_v38 }
 0x174   : > { %1128 = vmatprep.subr.bf16.mxu1 %v1435_v3 }
 0x177   : > { %1129 = vmatpush3.bf16.msra.mxu1 %v1260_v39 }
 0x178   : > { %1130 = vmatprep.subr.bf16.mxu1 %v1435_v3 }
 0x17b   : > { %1131 = vmatpush3.bf16.msra.mxu1 %v1261_v40 }
 0x17c   : > { %1132 = vmatprep.subr.bf16.mxu1 %v1435_v3 }
 0x17f   : > { %1133 = vmatpush3.bf16.msra.mxu1 %v1262_v41 }
 0x180   : > { %1134 = vmatprep.subr.bf16.mxu1 %v1435_v3 }
 0x183   : > { %1135 = vmatpush3.bf16.msra.mxu1 %v1263_v51 }
 0x184   : > { %1136 = vmatprep.subr.bf16.mxu1 %v1435_v3 }
 0x187   : > { %1137 = vmatpush3.bf16.msra.mxu1 %v1264_v52 }
 0x235   : > { %v468_v42 = vpop.f32.mrb[0].mxu1 }
 0x236   : > { %v470_v43 = vpop.f32.mrb[1].mxu1  ;;  %v554_v45 = vmax.f32 %v468_v42, 0.0 }
 0x239   : > { %v474_v44 = vpop.f32.mrb[2].mxu1 }
 0x23a   : > { %v555_v46 = vmax.f32 %v474_v44, 0.0  ;;  %v476_v47 = vpop.f32.mrb[3].mxu1 }
 0x23c   : > { %v556_v48 = vpack.c.bf16 %v555_v46, %v554_v45 }
 0x23d   : > { %v1101_v49 = vpop.f32.mrb[4].mxu1 }
 0x23e   : > { %v545_v50 = vpop.f32.mrb[5].mxu1  ;;  %1119 = vmatmul.mubr.bf16.vlgmr.msra.gmra.mrb[0].mxu0 %v556_v48 }
 0x23f   : > { %1158 = vmatprep.mubr.msk.bf16.mxu0 %vm1437_vm5, %v1435_v3  ;;  %1143 = vmatpush3.bf16.msra.mxu0 %v1265_v53 }
 0x240   : > { %1144 = vmatprep.subr.bf16.mxu0 %v1435_v3 }
 0x243   : > { %1145 = vmatpush3.bf16.msra.mxu0 %v1266_v54 }
 0x244   : > { %1146 = vmatprep.subr.bf16.mxu0 %v1435_v3 }
 0x247   : > { %1147 = vmatpush3.bf16.msra.mxu0 %v1267_v55 }
 0x248   : > { %1148 = vmatprep.subr.bf16.mxu0 %v1435_v3 }
 0x24b   : > { %1149 = vmatpush3.bf16.msra.mxu0 %v1268_v56 }
 0x24c   : > { %1150 = vmatprep.subr.bf16.mxu0 %v1435_v3 }
 0x24f   : > { %1151 = vmatpush3.bf16.msra.mxu0 %v1269_v57 }
 0x250   : > { %1152 = vmatprep.subr.bf16.mxu0 %v1435_v3 }
 0x253   : > { %1153 = vmatpush3.bf16.msra.mxu0 %v1270_v58 }
 0x254   : > { %1154 = vmatprep.subr.bf16.mxu0 %v1435_v3 }
 0x257   : > { %1155 = vmatpush3.bf16.msra.mxu0 %v1271_v5 }
 0x258   : > { %1156 = vmatprep.subr.bf16.mxu0 %v1435_v3 }
 0x25b   : > { %1157 = vmatpush3.bf16.msra.mxu0 %v1272_v6 }
 0x311   : > { %v655_v59 = vpop.f32.mrb[0].mxu0 }
 0x312   : > { %v656_v60 = vadd.f32 %v655_v59, %v470_v43  ;;  %v1120_v61 = vpop.f32.mrb[1].mxu0 }
 0x313   : > { %v658_v62 = vpop.f32.mrb[2].mxu0 }
 0x314   : > { %v659_v63 = vadd.f32 %v658_v62, %v476_v47  ;;  %v1121_v0 = vpop.f32.mrb[3].mxu0  ;;  %v662_v1 = vmax.f32 %v656_v60, 0.0 }
 0x316   : > { %v663_v2 = vmax.f32 %v659_v63, 0.0 }
 0x318   : > { %v664_v4 = vpack.c.bf16 %v663_v2, %v662_v1 }
 0x31a   : > { %1139 = vmatmul.mubr.bf16.vlgmr.msra.gmra.mrb[8].mxu1 %v664_v4 }
 0x3ed   : > { %v763_v7 = vpop.f32.mrb[8].mxu1 }
 0x3ee   : > { %v764_v8 = vadd.f32 %v763_v7, %v545_v50  ;;  %v1140_v9 = vpop.f32.mrb[9].mxu1 }
 0x3ef   : > { %v766_v10 = vpop.f32.mrb[10].mxu1 }
 0x3f0   : > { %v767_v11 = vadd.f32 %v1101_v49, %v766_v10  ;;  %v1141_v12 = vpop.f32.mrb[11].mxu1  ;;  %v770_v13 = vmax.f32 %v764_v8, 0.0 }
 0x3f2   : > { %v771_v14 = vmax.f32 %v767_v11, 0.0 }
 0x3f4   : > { %v772_v15 = vpack.c.bf16 %v771_v14, %v770_v13 }
 0x3f6   : > { %1159 = vmatmul.mubr.bf16.vlgmr.msra.gmra.mrb[4].mxu0 %v772_v15 }
 0x4c9   : > { %v878_v3 = vpop.f32.mrb[4].mxu0 }
 0x4ca   : > { %v879_v17 = vadd.f32 %v1046_v16, %v878_v3  ;;  %v1160_v18 = vpop.f32.mrb[5].mxu0 }
 0x4cb   : > { %v881_v19 = vpop.f32.mrb[6].mxu0 }
 0x4cc   : > { %885 = vst [vmem:[%s332_s15] sm:$0xff] %v879_v17  ;;  %v882_v20 = vadd.f32 %v1046_v16, %v881_v19  ;;  %v1161_v21 = vpop.f32.mrb[7].mxu0 }
 0x4ce   : > { %886 = vst [vmem:[%s332_s15 + $0x8] sm:$0xff] %v882_v20 }
 0x4cf   : > { %1370 = shalt.err (!%p1367_p9)
}
 0x4d0   : > { %s1371_s29 = scalar_lea.hbm %s1727_s21, 256  ;;  %s1375_s16 = scalar_lea.hbm %s1777_s7, 512 }
 0x4d1   : > { %p1372_p2 = scmp.ne.s32.totalorder %s1727_s21, %s1371_s29  ;;  %p1376_p5 = scmp.lt.u32.totalorder %s1727_s21, %s1777_s7 }
 0x4d2   : > { %p1377_p10 = scmp.lt.u32.totalorder %s1375_s16, %s1371_s29  ;;  %p1379_p4 = scmp.lt.u32.totalorder %s1371_s29, %s1727_s21 }
 0x4d3   : > { %p1373_p0 = pnand %p1372_p2, %p1797_p7 }
 0x4d4   : > { %p1378_p12 = por %p1377_p10, %p1376_p5 }
 0x4d5   : > { %p1374_p3 = pneg %p1373_p0 }
 0x4d6   : > { %p1380_p8 = por %p1379_p4, %p1378_p12 }
 0x4d8   : > { %p1381_p11 = pnand %p1380_p8, %p1374_p3 }
 0x4da   : > { %1384 = shalt.err (!%p1381_p11)
}
 0x4db   : > { %s1439_s19 = smov 128   ;;  %s1440_s15 = smov 8  }
 0x4dc   : > { %1182 = dma.vmem_to_hbm [thread:$0]  (%p1797_p7), %s1722_s18, 256, %s1727_s21, %s1729_s22, %s1439_s19, %s1439_s19, %s1440_s15  }
 0x4dd PF: > { %p1204_p13 = scmp.ge.s32.totalorder %s1427_s27, 2  ;;  %s916_s26 = sand.u32 1, %s1415_s24  }
 0x4de   : > { %p1798_p1 = scmp.ne.s32.totalorder %s1788_s12, 0  ;;  %s917_s20 = scalar_lea.sflag [#allocation4], %s916_s26 }
 0x4e0   : > { %p1195_p6 = pnand %p1204_p13, %p1798_p1 }
 0x4e2   : > { %1410 = dma.done.wait (!%p1195_p6), %s917_s20, 256  }
 0x4e3   : > { %1412 = vsyncadd (!%p1195_p6), %s917_s20, 4294967040  ;;  %s1799_s27 = sld [smem:[#allocation13_spill]]  ;;  %s1800_s9 = sld [smem:[#allocation12_spill]] }
 0x4e4   : > { %s1801_s26 = sld [smem:[#allocation14_spill]]  ;;  %s1802_s24 = smov %s1419_s25 }
 0x4e9   : > { %p19_p9 = scmp.ge.s32.totalorder %s1799_s27, 4   ;;  %s1803_s25 = smov %s1800_s9 }
 0x4eb   :  { %21 = sbr.rel (!%p19_p9) target bundleno = 5 (0x5), region = 99 }
 0x4f2   :  { %922 = vsyncpa [#allocation3], 1 }
 0x4f3   :  { %924 = vsyncpa [#allocation3 + $0x1], 1 }
 0x4f4   :  { %925 = vsyncpa [#allocation6], 1 }
 0x4f5   :  { %926 = vsyncpa [#allocation4], 1 }
 0x4f6   :  { %928 = vsyncpa [#allocation4 + $0x1], 1 }

</bundles_post_ra>
